<compile_context>
chip_gen: v7x
topology: tpu7x:2x2x1
jax: 0.10.0
libtpu: 0.0.40
codegen_flags: <defaults>
</compile_context>

<pallas_src>
import math
import functools

import jax
import jax.numpy as jnp
from jax.experimental import pallas as pl
from jax.experimental.pallas import tpu as pltpu


def _shuffle_label_kernel(x_ref, o_ref, *, starts, out_len, label_val,
                          num_chunks):
    """One grid step handles one row tile of the flattened leading dims.

    x_ref : VMEM (chunk_rows, T)                  auto-pipelined input rows
    o_ref : VMEM (num_chunks + 1, chunk_rows, L)  auto-pipelined output slab
    """
    # Chunk starts are trace-time constants -> fully static slices (no dynamic
    # lane indexing, no DMA semaphores), unrolled over the (small) chunk count.
    for k, s in enumerate(starts):
        o_ref[k] = x_ref[:, s:s + out_len]
    # Constant label plane: pure VPU splat, no HBM read for this slot.
    o_ref[num_chunks] = jnp.full(
        (o_ref.shape[1], o_ref.shape[2]), label_val, dtype=o_ref.dtype)


def _round_up(a, b):
    return -(-a // b) * b


def _pick_row_tile(R, T, out_len, num_out, itemsize, budget_bytes=4 << 20):
    """Pick chunk_rows: dtype-aware sublane multiple, single-buffer working set
    (input slab + output slab, with lane/sublane layout padding) <= budget."""
    sublane_pack = max(1, 4 // itemsize)       # elems per 32-bit sublane word
    row_mult = 8 * sublane_pack                # 8 (f32) / 16 (bf16) / 32 (i8)
    padded_t = _round_up(T, 128)
    padded_l = _round_up(out_len, 128)
    bytes_per_row = (padded_t + num_out * padded_l) * itemsize
    max_rows = max(1, budget_bytes // bytes_per_row)
    if R <= max_rows:
        return R                               # block == full dim: always legal
    rows = max(row_mult, (max_rows // row_mult) * row_mult)
    return min(rows, R)


def _resolve_geometry(T, chunk_order, sampling_rate, chunk_size,
                      number_of_chunks):
    """Mirror the PyTorch module's defaulting logic exactly."""
    if sampling_rate is None and chunk_size is None and number_of_chunks is None:
        raise ValueError(
            "sampling_rate, chunk_size and number_of_chunks cannot be None "
            "together.")
    if number_of_chunks is not None:
        invalid = [i for i in chunk_order if i < 0 or i >= number_of_chunks]
        if invalid:
            raise ValueError(f"Invalid chunk order {invalid}.")

    if sampling_rate is None and chunk_size is None:
        sampling_rate = 1
        chunk_size = math.ceil(T / number_of_chunks)
    if chunk_size is None and sampling_rate is not None:
        chunk_size = math.ceil(T / (number_of_chunks * sampling_rate))
    elif sampling_rate is None and chunk_size is not None:
        sampling_rate = math.ceil(T / (number_of_chunks * chunk_size))

    L = int(chunk_size * sampling_rate)
    starts, lengths = [], []
    for i in chunk_order:
        end = min(T, int((i + 1) * chunk_size * sampling_rate))
        start = max(0, end - L)
        starts.append(start)
        lengths.append(end - start)
    out_len = lengths[0]
    if any(l != out_len for l in lengths):
        # torch.stack in the reference module would fail in this situation too.
        raise ValueError("Chunks have unequal lengths; cannot stack.")
    return tuple(starts), out_len


def shuffle_label(x, chunk_order, label, sampling_rate=None, chunk_size=None,
                  number_of_chunks=None, prefer_pallas=None):
    """JAX/Pallas equivalent of ShuffleLabel/ChunkShuffleLabel.forward."""
    T = x.shape[-1]
    starts, out_len = _resolve_geometry(T, chunk_order, sampling_rate,
                                        chunk_size, number_of_chunks)

    num_chunks = len(chunk_order)
    num_out = num_chunks + 1
    lead_shape = x.shape[:-1]
    R = int(math.prod(lead_shape)) if lead_shape else 1
    x2d = x.reshape(R, T)
    itemsize = jnp.dtype(x.dtype).itemsize

    # Pure memory op: bytes read once + bytes written once.
    traffic_bytes = (R * T + num_out * R * out_len) * itemsize

    # Tiny problems: per-grid-step overhead (~0.35 us) dominates -> plain XLA.
    use_pallas = (prefer_pallas if prefer_pallas is not None
                  else traffic_bytes >= (1 << 20))
    if not use_pallas:
        chunks = [jax.lax.slice_in_dim(x2d, s, s + out_len, axis=1)
                  for s in starts]
        chunks.append(jnp.full((R, out_len), label, dtype=x.dtype))
        return jnp.stack(chunks).reshape((num_out,) + lead_shape + (out_len,))

    chunk_rows = _pick_row_tile(R, T, out_len, num_out, itemsize)
    nr = pl.cdiv(R, chunk_rows)   # ragged last tile OK (pipeline masks writeback)

    kernel = functools.partial(
        _shuffle_label_kernel,
        starts=starts,
        out_len=out_len,
        label_val=label,
        num_chunks=num_chunks,
    )

    out = pl.pallas_call(
        kernel,
        out_shape=jax.ShapeDtypeStruct((num_out, R, out_len), x.dtype),
        grid=(nr,),
        in_specs=[
            # Full-width contiguous row slab, auto double-buffered by Pallas.
            pl.BlockSpec((chunk_rows, T), lambda r: (r, 0)),
        ],
        out_specs=pl.BlockSpec((num_out, chunk_rows, out_len),
                               lambda r: (0, r, 0)),
        compiler_params=pltpu.CompilerParams(
            dimension_semantics=("parallel",),
        ),
        cost_estimate=pl.CostEstimate(
            flops=0, transcendentals=0, bytes_accessed=int(traffic_bytes)),
    )(x2d)

    return out.reshape((num_out,) + lead_shape + (out_len,))


def _reference(x, chunk_order, label, sampling_rate=None, chunk_size=None,
               number_of_chunks=None):
    """Pure-JAX mirror of the PyTorch forward (for checking)."""
    T = x.shape[-1]
    if sampling_rate is None and chunk_size is None:
        sampling_rate = 1
        chunk_size = math.ceil(T / number_of_chunks)
    if chunk_size is None and sampling_rate is not None:
        chunk_size = math.ceil(T / (number_of_chunks * sampling_rate))
    elif sampling_rate is None and chunk_size is not None:
        sampling_rate = math.ceil(T / (number_of_chunks * chunk_size))
    L = int(chunk_size * sampling_rate)
    chunks = []
    for i in chunk_order:
        end = min(T, int((i + 1) * chunk_size * sampling_rate))
        start = max(0, end - L)
        chunks.append(x[..., start:end])
    chunks.append(jnp.full(chunks[0].shape, label, dtype=x.dtype))
    return jnp.stack(chunks)


if __name__ == "__main__":
    key = jax.random.PRNGKey(0)
    k0, k1 = jax.random.split(key)

    chunk_order = [2, 0, 3, 1]
    number_of_chunks = 4
    label = 3

    # Case 1: NCHW spectrogram, chunk-aligned time axis (T=16 -> L=4).
    x = jax.random.normal(k0, (2, 4, 16, 16), dtype=jnp.float32)
    out = shuffle_label(x, chunk_order, label,
                        number_of_chunks=number_of_chunks, prefer_pallas=True)
    out = jax.block_until_ready(out)
    ref = _reference(x, chunk_order, label, number_of_chunks=number_of_chunks)
    assert out.shape == ref.shape, (out.shape, ref.shape)
    assert bool(jnp.array_equal(out, ref)), "mismatch vs reference (aligned case)"

    # Case 2: T=18 -> L=5, last chunk starts at the lane-unaligned offset 13.
    x2 = jax.random.normal(k1, (2, 4, 16, 18), dtype=jnp.float32)
    out2 = shuffle_label(x2, chunk_order, label,
                         number_of_chunks=number_of_chunks, prefer_pallas=True)
    out2 = jax.block_until_ready(out2)
    ref2 = _reference(x2, chunk_order, label, number_of_chunks=number_of_chunks)
    assert out2.shape == ref2.shape, (out2.shape, ref2.shape)
    assert bool(jnp.array_equal(out2, ref2)), "mismatch vs reference (unaligned case)"

    # TODO(synk): PIL/numpy -> tensor input-type dispatch from the PyTorch
    # module is host-side glue and has no Pallas equivalent.
    print("KERNEL_OK")
</pallas_src>

<mosaic_0001>
module attributes {stable_mosaic.version = 11 : i64} {
  func.func @_shuffle_label_kernel(%arg0: i32, %arg1: memref<128x16xf32, #tpu.memory_space<vmem>>, %arg2: memref<5x128x4xf32, #tpu.memory_space<vmem>>) attributes {dimension_semantics = [#tpu.dimension_semantics<parallel>], iteration_bounds = array<i64: 1>, scalar_prefetch = 0 : i64, scratch_operands = 0 : i64, tpu.core_type = #tpu.core_type<tc>, window_params = [{transform_indices = @transform_0, window_bounds = array<i64: 128, 16>}, {transform_indices = @transform_1, window_bounds = array<i64: 5, 128, 4>}]} {
    %c0 = arith.constant 0 : index
    %c8 = arith.constant 8 : index
    %0 = vector.load %arg1[%c0, %c8] : memref<128x16xf32, #tpu.memory_space<vmem>>, vector<128x4xf32>
    %c0_0 = arith.constant 0 : index
    %c0_1 = arith.constant 0 : index
    %c0_2 = arith.constant 0 : index
    %1 = vector.load %arg2[%c0_0, %c0_1, %c0_2] : memref<5x128x4xf32, #tpu.memory_space<vmem>>, vector<1x128x4xf32>
    %2 = vector.shape_cast %1 : vector<1x128x4xf32> to vector<128x4xf32>
    %3 = vector.shape_cast %0 : vector<128x4xf32> to vector<1x128x4xf32>
    tpu.vector_store %arg2[%c0_0, %c0_1, %c0_2], %3 {strides = array<i32>} : memref<5x128x4xf32, #tpu.memory_space<vmem>>, vector<1x128x4xf32>,
    %c0_3 = arith.constant 0 : index
    %c0_4 = arith.constant 0 : index
    %4 = vector.load %arg1[%c0_3, %c0_4] : memref<128x16xf32, #tpu.memory_space<vmem>>, vector<128x4xf32>
    %c1 = arith.constant 1 : index
    %c0_5 = arith.constant 0 : index
    %c0_6 = arith.constant 0 : index
    %5 = vector.load %arg2[%c1, %c0_5, %c0_6] : memref<5x128x4xf32, #tpu.memory_space<vmem>>, vector<1x128x4xf32>
    %6 = vector.shape_cast %5 : vector<1x128x4xf32> to vector<128x4xf32>
    %7 = vector.shape_cast %4 : vector<128x4xf32> to vector<1x128x4xf32>
    tpu.vector_store %arg2[%c1, %c0_5, %c0_6], %7 {strides = array<i32>} : memref<5x128x4xf32, #tpu.memory_space<vmem>>, vector<1x128x4xf32>,
    %c0_7 = arith.constant 0 : index
    %c12 = arith.constant 12 : index
    %8 = vector.load %arg1[%c0_7, %c12] : memref<128x16xf32, #tpu.memory_space<vmem>>, vector<128x4xf32>
    %c2 = arith.constant 2 : index
    %c0_8 = arith.constant 0 : index
    %c0_9 = arith.constant 0 : index
    %9 = vector.load %arg2[%c2, %c0_8, %c0_9] : memref<5x128x4xf32, #tpu.memory_space<vmem>>, vector<1x128x4xf32>
    %10 = vector.shape_cast %9 : vector<1x128x4xf32> to vector<128x4xf32>
    %11 = vector.shape_cast %8 : vector<128x4xf32> to vector<1x128x4xf32>
    tpu.vector_store %arg2[%c2, %c0_8, %c0_9], %11 {strides = array<i32>} : memref<5x128x4xf32, #tpu.memory_space<vmem>>, vector<1x128x4xf32>,
    %c0_10 = arith.constant 0 : index
    %c4 = arith.constant 4 : index
    %12 = vector.load %arg1[%c0_10, %c4] : memref<128x16xf32, #tpu.memory_space<vmem>>, vector<128x4xf32>
    %c3 = arith.constant 3 : index
    %c0_11 = arith.constant 0 : index
    %c0_12 = arith.constant 0 : index
    %13 = vector.load %arg2[%c3, %c0_11, %c0_12] : memref<5x128x4xf32, #tpu.memory_space<vmem>>, vector<1x128x4xf32>
    %14 = vector.shape_cast %13 : vector<1x128x4xf32> to vector<128x4xf32>
    %15 = vector.shape_cast %12 : vector<128x4xf32> to vector<1x128x4xf32>
    tpu.vector_store %arg2[%c3, %c0_11, %c0_12], %15 {strides = array<i32>} : memref<5x128x4xf32, #tpu.memory_space<vmem>>, vector<1x128x4xf32>,
    %cst = arith.constant 3.000000e+00 : f32
    %16 = vector.broadcast %cst : f32 to vector<128x4xf32>
    %c4_13 = arith.constant 4 : index
    %c0_14 = arith.constant 0 : index
    %c0_15 = arith.constant 0 : index
    %17 = vector.load %arg2[%c4_13, %c0_14, %c0_15] : memref<5x128x4xf32, #tpu.memory_space<vmem>>, vector<1x128x4xf32>
    %18 = vector.shape_cast %17 : vector<1x128x4xf32> to vector<128x4xf32>
    %19 = vector.shape_cast %16 : vector<128x4xf32> to vector<1x128x4xf32>
    tpu.vector_store %arg2[%c4_13, %c0_14, %c0_15], %19 {strides = array<i32>} : memref<5x128x4xf32, #tpu.memory_space<vmem>>, vector<1x128x4xf32>,
    return
  }
  func.func @transform_0(%arg0: i32) -> (i32, i32) {
    %c0_i32 = arith.constant 0 : i32
    %c0_i32_0 = arith.constant 0 : i32
    return %arg0, %c0_i32 : i32, i32
  }
  func.func @transform_1(%arg0: i32) -> (i32, i32, i32) {
    %c0_i32 = arith.constant 0 : i32
    %c0_i32_0 = arith.constant 0 : i32
    %c0_i32_1 = arith.constant 0 : i32
    return %c0_i32, %arg0, %c0_i32_0 : i32, i32, i32
  }
}

</mosaic_0001>

<bundles_post_ra>
// kernel: tpu_custom_call.1
= control target key start
LH: loop header
LB: loop body
LE: loop exit
PB: predicated region body
PF: predicated region fallthrough
CT: control target
= control target key end

     0   :  { %vm88_vm0 = vcmask 31744   ;;  %s421_s12 = smov 120   ;;  %s422_s14 = smov 116   ;;  %v424_v16 = vmov 3.0   ;;  %s907_s0 = inlined_call_operand.vmem [shape: f32[128,16], index: 0, kind: input, shape index: {}]   ;;  %s908_s1 = inlined_call_operand.vmem [shape: f32[5,128,4], index: 1, kind: output, shape index: {}]  }
   0x1   :  { %v438_v0 = vld [vmem:[%s907_s0 + $0x10] sm:$0xff]  ;;  %v443_v1 = vld [vmem:[%s907_s0] sm:$0xff]  ;;  %v448_v2 = vld [vmem:[%s907_s0 + $0x18] sm:$0xff]  ;;  %401 = vst.msk [vmem:[%s908_s1 + $0x200] sm:$0xff] %vm88_vm0, %v424_v16 }
   0x2   :  { %44 = vrot.lane.b32.xlu1 %v438_v0, %s421_s12  ;;  %40 = vrot.lane.b32.xlu0 %v443_v1, %s421_s12  ;;  %v9_v3 = vld [vmem:[%s907_s0 + $0x8] sm:$0xff]  ;;  %353 = vst.msk [vmem:[%s908_s1 + $0x80] sm:$0xff] %vm88_vm0, %v443_v1 }
   0x3   :  { %v460_v4 = vld [vmem:[%s907_s0 + $0x28] sm:$0xff]  ;;  %355 = vst.msk [vmem:[%s908_s1 + $0x90] sm:$0xff] %vm88_vm0, %v438_v0  ;;  %356 = vst.msk [vmem:[%s908_s1 + $0x98] sm:$0xff] %vm88_vm0, %v448_v2  ;;  %v12_v5 = vld [vmem:[%s907_s0 + $0x20] sm:$0xff] }
   0x4   :  { %v15_v6 = vld [vmem:[%s907_s0 + $0x38] sm:$0xff]  ;;  %v14_v7 = vld [vmem:[%s907_s0 + $0x30] sm:$0xff]  ;;  %354 = vst.msk [vmem:[%s908_s1 + $0x88] sm:$0xff] %vm88_vm0, %v9_v3  ;;  %358 = vst.msk [vmem:[%s908_s1 + $0xa8] sm:$0xff] %vm88_vm0, %v460_v4 }
   0x5   :  { %v498_v8 = vld [vmem:[%s907_s0 + $0x48] sm:$0xff]  ;;  %v503_v9 = vld [vmem:[%s907_s0 + $0x40] sm:$0xff]  ;;  %v508_v10 = vld [vmem:[%s907_s0 + $0x58] sm:$0xff]  ;;  %357 = vst.msk [vmem:[%s908_s1 + $0xa0] sm:$0xff] %vm88_vm0, %v12_v5 }
   0x6   :  { %359 = vst.msk [vmem:[%s908_s1 + $0xb0] sm:$0xff] %vm88_vm0, %v14_v7  ;;  %360 = vst.msk [vmem:[%s908_s1 + $0xb8] sm:$0xff] %vm88_vm0, %v15_v6  ;;  %v525_v11 = vld [vmem:[%s907_s0 + $0x50] sm:$0xff]  ;;  %v530_v12 = vld [vmem:[%s907_s0 + $0x68] sm:$0xff] }
   0x7   :  { %v535_v13 = vld [vmem:[%s907_s0 + $0x60] sm:$0xff]  ;;  %361 = vst.msk [vmem:[%s908_s1 + $0xc0] sm:$0xff] %vm88_vm0, %v503_v9  ;;  %362 = vst.msk [vmem:[%s908_s1 + $0xc8] sm:$0xff] %vm88_vm0, %v498_v8  ;;  %46 = vrot.lane.b32.xlu1 %v448_v2, %s421_s12 }
   0x8   :  { %364 = vst.msk [vmem:[%s908_s1 + $0xd8] sm:$0xff] %vm88_vm0, %v508_v10  ;;  %42 = vrot.lane.b32.xlu0 %v9_v3, %s421_s12  ;;  %v558_v14 = vld [vmem:[%s907_s0 + $0x78] sm:$0xff]  ;;  %v563_v15 = vld [vmem:[%s907_s0 + $0x70] sm:$0xff] }
   0x9   :  { %363 = vst.msk [vmem:[%s908_s1 + $0xd0] sm:$0xff] %vm88_vm0, %v525_v11  ;;  %365 = vst.msk [vmem:[%s908_s1 + $0xe0] sm:$0xff] %vm88_vm0, %v535_v13 }
   0xa   :  { %366 = vst.msk [vmem:[%s908_s1 + $0xe8] sm:$0xff] %vm88_vm0, %v530_v12  ;;  %367 = vst.msk [vmem:[%s908_s1 + $0xf0] sm:$0xff] %vm88_vm0, %v563_v15 }
   0xb   :  { %368 = vst.msk [vmem:[%s908_s1 + $0xf8] sm:$0xff] %vm88_vm0, %v558_v14  ;;  %50 = vrot.lane.b32.xlu1 %v460_v4, %s421_s12  ;;  %402 = vst.msk [vmem:[%s908_s1 + $0x208] sm:$0xff] %vm88_vm0, %v424_v16 }
   0xc   :  { %48 = vrot.lane.b32.xlu0 %v12_v5, %s421_s12  ;;  %403 = vst.msk [vmem:[%s908_s1 + $0x210] sm:$0xff] %vm88_vm0, %v424_v16  ;;  %404 = vst.msk [vmem:[%s908_s1 + $0x218] sm:$0xff] %vm88_vm0, %v424_v16 }
   0xd   :  { %405 = vst.msk [vmem:[%s908_s1 + $0x220] sm:$0xff] %vm88_vm0, %v424_v16  ;;  %406 = vst.msk [vmem:[%s908_s1 + $0x228] sm:$0xff] %vm88_vm0, %v424_v16 }
   0xe   :  { %407 = vst.msk [vmem:[%s908_s1 + $0x230] sm:$0xff] %vm88_vm0, %v424_v16  ;;  %408 = vst.msk [vmem:[%s908_s1 + $0x238] sm:$0xff] %vm88_vm0, %v424_v16 }
   0xf   :  { %54 = vrot.lane.b32.xlu1 %v15_v6, %s421_s12  ;;  %409 = vst.msk [vmem:[%s908_s1 + $0x240] sm:$0xff] %vm88_vm0, %v424_v16  ;;  %410 = vst.msk [vmem:[%s908_s1 + $0x248] sm:$0xff] %vm88_vm0, %v424_v16 }
  0x10   :  { %52 = vrot.lane.b32.xlu0 %v14_v7, %s421_s12  ;;  %411 = vst.msk [vmem:[%s908_s1 + $0x250] sm:$0xff] %vm88_vm0, %v424_v16  ;;  %412 = vst.msk [vmem:[%s908_s1 + $0x258] sm:$0xff] %vm88_vm0, %v424_v16 }
  0x11   :  { %413 = vst.msk [vmem:[%s908_s1 + $0x260] sm:$0xff] %vm88_vm0, %v424_v16  ;;  %414 = vst.msk [vmem:[%s908_s1 + $0x268] sm:$0xff] %vm88_vm0, %v424_v16 }
  0x12   :  { %415 = vst.msk [vmem:[%s908_s1 + $0x270] sm:$0xff] %vm88_vm0, %v424_v16  ;;  %416 = vst.msk [vmem:[%s908_s1 + $0x278] sm:$0xff] %vm88_vm0, %v424_v16 }
  0x13   :  { %58 = vrot.lane.b32.xlu1 %v498_v8, %s421_s12 }
  0x14   :  { %56 = vrot.lane.b32.xlu0 %v503_v9, %s421_s12 }
  0x17   :  { %62 = vrot.lane.b32.xlu1 %v508_v10, %s421_s12 }
  0x18   :  { %60 = vrot.lane.b32.xlu0 %v525_v11, %s421_s12 }
  0x1b   :  { %66 = vrot.lane.b32.xlu1 %v530_v12, %s421_s12 }
  0x1c   :  { %64 = vrot.lane.b32.xlu0 %v535_v13, %s421_s12 }
  0x1f   :  { %70 = vrot.lane.b32.xlu1 %v558_v14, %s421_s12 }
  0x20   :  { %68 = vrot.lane.b32.xlu0 %v563_v15, %s421_s12  ;;  %s423_s12 = smov 124  }
  0x23   :  { %172 = vrot.lane.b32.xlu1 %v9_v3, %s422_s14 }
  0x24   :  { %170 = vrot.lane.b32.xlu0 %v443_v1, %s422_s14 }
  0x27   :  { %176 = vrot.lane.b32.xlu1 %v448_v2, %s422_s14 }
  0x28   :  { %174 = vrot.lane.b32.xlu0 %v438_v0, %s422_s14 }
  0x2b   :  { %180 = vrot.lane.b32.xlu1 %v460_v4, %s422_s14 }
  0x2c   :  { %178 = vrot.lane.b32.xlu0 %v12_v5, %s422_s14 }
  0x2f   :  { %184 = vrot.lane.b32.xlu1 %v15_v6, %s422_s14 }
  0x30   :  { %182 = vrot.lane.b32.xlu0 %v14_v7, %s422_s14 }
  0x33   :  { %188 = vrot.lane.b32.xlu1 %v498_v8, %s422_s14 }
  0x34   :  { %186 = vrot.lane.b32.xlu0 %v503_v9, %s422_s14 }
  0x37   :  { %192 = vrot.lane.b32.xlu1 %v508_v10, %s422_s14 }
  0x38   :  { %190 = vrot.lane.b32.xlu0 %v525_v11, %s422_s14 }
  0x3b   :  { %196 = vrot.lane.b32.xlu1 %v530_v12, %s422_s14 }
  0x3c   :  { %194 = vrot.lane.b32.xlu0 %v535_v13, %s422_s14 }
  0x3f   :  { %200 = vrot.lane.b32.xlu1 %v558_v14, %s422_s14 }
  0x40   :  { %198 = vrot.lane.b32.xlu0 %v563_v15, %s422_s14 }
  0x43   :  { %269 = vrot.lane.b32.xlu1 %v9_v3, %s423_s12 }
  0x44   :  { %267 = vrot.lane.b32.xlu0 %v443_v1, %s423_s12 }
  0x47   :  { %273 = vrot.lane.b32.xlu1 %v448_v2, %s423_s12 }
  0x48   :  { %271 = vrot.lane.b32.xlu0 %v438_v0, %s423_s12 }
  0x4b   :  { %277 = vrot.lane.b32.xlu1 %v460_v4, %s423_s12 }
  0x4c   :  { %275 = vrot.lane.b32.xlu0 %v12_v5, %s423_s12 }
  0x4f   :  { %281 = vrot.lane.b32.xlu1 %v15_v6, %s423_s12 }
  0x50   :  { %279 = vrot.lane.b32.xlu0 %v14_v7, %s423_s12 }
  0x53   :  { %285 = vrot.lane.b32.xlu1 %v498_v8, %s423_s12 }
  0x54   :  { %283 = vrot.lane.b32.xlu0 %v503_v9, %s423_s12 }
  0x57   :  { %289 = vrot.lane.b32.xlu1 %v508_v10, %s423_s12 }
  0x58   :  { %287 = vrot.lane.b32.xlu0 %v525_v11, %s423_s12 }
  0x5b   :  { %293 = vrot.lane.b32.xlu1 %v530_v12, %s423_s12 }
  0x5c   :  { %291 = vrot.lane.b32.xlu0 %v535_v13, %s423_s12 }
  0x5f   :  { %297 = vrot.lane.b32.xlu1 %v558_v14, %s423_s12 }
  0x60   :  { %295 = vrot.lane.b32.xlu0 %v563_v15, %s423_s12 }
  0x74   :  { %v45_v17 = vpop.permute.xlu1 %44  ;;  %v41_v18 = vpop.permute.xlu0 %40 }
  0x75   :  { %91 = vst.msk [vmem:[%s908_s1 + $0x10] sm:$0xff] %vm88_vm0, %v45_v17  ;;  %89 = vst.msk [vmem:[%s908_s1] sm:$0xff] %vm88_vm0, %v41_v18 }
  0x79   :  { %v47_v19 = vpop.permute.xlu1 %46 }
  0x7a   :  { %v43_v20 = vpop.permute.xlu0 %42  ;;  %92 = vst.msk [vmem:[%s908_s1 + $0x18] sm:$0xff] %vm88_vm0, %v47_v19 }
  0x7b   :  { %90 = vst.msk [vmem:[%s908_s1 + $0x8] sm:$0xff] %vm88_vm0, %v43_v20 }
  0x7d   :  { %v51_v21 = vpop.permute.xlu1 %50 }
  0x7e   :  { %v49_v22 = vpop.permute.xlu0 %48  ;;  %94 = vst.msk [vmem:[%s908_s1 + $0x28] sm:$0xff] %vm88_vm0, %v51_v21 }
  0x7f   :  { %93 = vst.msk [vmem:[%s908_s1 + $0x20] sm:$0xff] %vm88_vm0, %v49_v22 }
  0x81   :  { %v55_v23 = vpop.permute.xlu1 %54 }
  0x82   :  { %v53_v24 = vpop.permute.xlu0 %52  ;;  %96 = vst.msk [vmem:[%s908_s1 + $0x38] sm:$0xff] %vm88_vm0, %v55_v23 }
  0x83   :  { %95 = vst.msk [vmem:[%s908_s1 + $0x30] sm:$0xff] %vm88_vm0, %v53_v24 }
  0x85   :  { %v59_v25 = vpop.permute.xlu1 %58 }
  0x86   :  { %v57_v26 = vpop.permute.xlu0 %56  ;;  %98 = vst.msk [vmem:[%s908_s1 + $0x48] sm:$0xff] %vm88_vm0, %v59_v25 }
  0x87   :  { %97 = vst.msk [vmem:[%s908_s1 + $0x40] sm:$0xff] %vm88_vm0, %v57_v26 }
  0x89   :  { %v63_v27 = vpop.permute.xlu1 %62 }
  0x8a   :  { %v61_v28 = vpop.permute.xlu0 %60  ;;  %100 = vst.msk [vmem:[%s908_s1 + $0x58] sm:$0xff] %vm88_vm0, %v63_v27 }
  0x8b   :  { %99 = vst.msk [vmem:[%s908_s1 + $0x50] sm:$0xff] %vm88_vm0, %v61_v28 }
  0x8d   :  { %v67_v29 = vpop.permute.xlu1 %66 }
  0x8e   :  { %v65_v30 = vpop.permute.xlu0 %64  ;;  %102 = vst.msk [vmem:[%s908_s1 + $0x68] sm:$0xff] %vm88_vm0, %v67_v29 }
  0x8f   :  { %101 = vst.msk [vmem:[%s908_s1 + $0x60] sm:$0xff] %vm88_vm0, %v65_v30 }
  0x91   :  { %v71_v31 = vpop.permute.xlu1 %70 }
  0x92   :  { %v69_v32 = vpop.permute.xlu0 %68  ;;  %104 = vst.msk [vmem:[%s908_s1 + $0x78] sm:$0xff] %vm88_vm0, %v71_v31 }
  0x93   :  { %103 = vst.msk [vmem:[%s908_s1 + $0x70] sm:$0xff] %vm88_vm0, %v69_v32 }
  0x95   :  { %v173_v33 = vpop.permute.xlu1 %172 }
  0x96   :  { %v171_v34 = vpop.permute.xlu0 %170  ;;  %370 = vst.msk [vmem:[%s908_s1 + $0x108] sm:$0xff] %vm88_vm0, %v173_v33 }
  0x97   :  { %369 = vst.msk [vmem:[%s908_s1 + $0x100] sm:$0xff] %vm88_vm0, %v171_v34 }
  0x99   :  { %v177_v35 = vpop.permute.xlu1 %176 }
  0x9a   :  { %v175_v36 = vpop.permute.xlu0 %174  ;;  %372 = vst.msk [vmem:[%s908_s1 + $0x118] sm:$0xff] %vm88_vm0, %v177_v35 }
  0x9b   :  { %371 = vst.msk [vmem:[%s908_s1 + $0x110] sm:$0xff] %vm88_vm0, %v175_v36 }
  0x9d   :  { %v181_v37 = vpop.permute.xlu1 %180 }
  0x9e   :  { %v179_v38 = vpop.permute.xlu0 %178  ;;  %374 = vst.msk [vmem:[%s908_s1 + $0x128] sm:$0xff] %vm88_vm0, %v181_v37 }
  0x9f   :  { %373 = vst.msk [vmem:[%s908_s1 + $0x120] sm:$0xff] %vm88_vm0, %v179_v38 }
  0xa1   :  { %v185_v39 = vpop.permute.xlu1 %184 }
  0xa2   :  { %v183_v40 = vpop.permute.xlu0 %182  ;;  %376 = vst.msk [vmem:[%s908_s1 + $0x138] sm:$0xff] %vm88_vm0, %v185_v39 }
  0xa3   :  { %375 = vst.msk [vmem:[%s908_s1 + $0x130] sm:$0xff] %vm88_vm0, %v183_v40 }
  0xa5   :  { %v189_v41 = vpop.permute.xlu1 %188 }
  0xa6   :  { %v187_v42 = vpop.permute.xlu0 %186  ;;  %378 = vst.msk [vmem:[%s908_s1 + $0x148] sm:$0xff] %vm88_vm0, %v189_v41 }
  0xa7   :  { %377 = vst.msk [vmem:[%s908_s1 + $0x140] sm:$0xff] %vm88_vm0, %v187_v42 }
  0xa9   :  { %v193_v43 = vpop.permute.xlu1 %192 }
  0xaa   :  { %v191_v44 = vpop.permute.xlu0 %190  ;;  %380 = vst.msk [vmem:[%s908_s1 + $0x158] sm:$0xff] %vm88_vm0, %v193_v43 }
  0xab   :  { %379 = vst.msk [vmem:[%s908_s1 + $0x150] sm:$0xff] %vm88_vm0, %v191_v44 }
  0xad   :  { %v197_v45 = vpop.permute.xlu1 %196 }
  0xae   :  { %v195_v46 = vpop.permute.xlu0 %194  ;;  %382 = vst.msk [vmem:[%s908_s1 + $0x168] sm:$0xff] %vm88_vm0, %v197_v45 }
  0xaf   :  { %381 = vst.msk [vmem:[%s908_s1 + $0x160] sm:$0xff] %vm88_vm0, %v195_v46 }
  0xb1   :  { %v201_v47 = vpop.permute.xlu1 %200 }
  0xb2   :  { %v199_v48 = vpop.permute.xlu0 %198  ;;  %384 = vst.msk [vmem:[%s908_s1 + $0x178] sm:$0xff] %vm88_vm0, %v201_v47 }
  0xb3   :  { %383 = vst.msk [vmem:[%s908_s1 + $0x170] sm:$0xff] %vm88_vm0, %v199_v48 }
  0xb5   :  { %v270_v49 = vpop.permute.xlu1 %269 }
  0xb6   :  { %v268_v50 = vpop.permute.xlu0 %267  ;;  %386 = vst.msk [vmem:[%s908_s1 + $0x188] sm:$0xff] %vm88_vm0, %v270_v49 }
  0xb7   :  { %385 = vst.msk [vmem:[%s908_s1 + $0x180] sm:$0xff] %vm88_vm0, %v268_v50 }
  0xb9   :  { %v274_v51 = vpop.permute.xlu1 %273 }
  0xba   :  { %v272_v52 = vpop.permute.xlu0 %271  ;;  %388 = vst.msk [vmem:[%s908_s1 + $0x198] sm:$0xff] %vm88_vm0, %v274_v51 }
  0xbb   :  { %387 = vst.msk [vmem:[%s908_s1 + $0x190] sm:$0xff] %vm88_vm0, %v272_v52 }
  0xbd   :  { %v278_v53 = vpop.permute.xlu1 %277 }
  0xbe   :  { %v276_v54 = vpop.permute.xlu0 %275  ;;  %390 = vst.msk [vmem:[%s908_s1 + $0x1a8] sm:$0xff] %vm88_vm0, %v278_v53 }
  0xbf   :  { %389 = vst.msk [vmem:[%s908_s1 + $0x1a0] sm:$0xff] %vm88_vm0, %v276_v54 }
  0xc1   :  { %v282_v55 = vpop.permute.xlu1 %281 }
  0xc2   :  { %v280_v56 = vpop.permute.xlu0 %279  ;;  %392 = vst.msk [vmem:[%s908_s1 + $0x1b8] sm:$0xff] %vm88_vm0, %v282_v55 }
  0xc3   :  { %391 = vst.msk [vmem:[%s908_s1 + $0x1b0] sm:$0xff] %vm88_vm0, %v280_v56 }
  0xc5   :  { %v286_v57 = vpop.permute.xlu1 %285 }
  0xc6   :  { %v284_v58 = vpop.permute.xlu0 %283  ;;  %394 = vst.msk [vmem:[%s908_s1 + $0x1c8] sm:$0xff] %vm88_vm0, %v286_v57 }
  0xc7   :  { %393 = vst.msk [vmem:[%s908_s1 + $0x1c0] sm:$0xff] %vm88_vm0, %v284_v58 }
  0xc9   :  { %v290_v59 = vpop.permute.xlu1 %289 }
  0xca   :  { %v288_v60 = vpop.permute.xlu0 %287  ;;  %396 = vst.msk [vmem:[%s908_s1 + $0x1d8] sm:$0xff] %vm88_vm0, %v290_v59 }
  0xcb   :  { %395 = vst.msk [vmem:[%s908_s1 + $0x1d0] sm:$0xff] %vm88_vm0, %v288_v60 }
  0xcd   :  { %v294_v61 = vpop.permute.xlu1 %293 }
  0xce   :  { %v292_v62 = vpop.permute.xlu0 %291  ;;  %398 = vst.msk [vmem:[%s908_s1 + $0x1e8] sm:$0xff] %vm88_vm0, %v294_v61 }
  0xcf   :  { %397 = vst.msk [vmem:[%s908_s1 + $0x1e0] sm:$0xff] %vm88_vm0, %v292_v62 }
  0xd1   :  { %v298_v63 = vpop.permute.xlu1 %297 }
  0xd2   :  { %v296_v0 = vpop.permute.xlu0 %295  ;;  %400 = vst.msk [vmem:[%s908_s1 + $0x1f8] sm:$0xff] %vm88_vm0, %v298_v63 }
  0xd3   :  { %399 = vst.msk [vmem:[%s908_s1 + $0x1f0] sm:$0xff] %vm88_vm0, %v296_v0 }

</bundles_post_ra>
